<compile_context>
chip_gen: v6e
topology: v6e:2x2x1
jax: 0.10.0
libtpu: 0.0.40
codegen_flags: <defaults>
</compile_context>

<pallas_src>
import jax
import jax.numpy as jnp
from jax.experimental import pallas as pl
from jax.experimental.pallas import tpu as pltpu  # noqa: F401  (TPU backend)


def squeeze_copy_kernel(x_ref, o_ref):
    # x_ref / o_ref: (B, N) in VMEM. Pure lane-dense vld/vst copy.
    o_ref[...] = x_ref[...]


def squeeze_last(x):
    """x: (B, N, 1) -> (B, N).

    The squeeze itself is done in the wrapper (metadata-only reshape) so the
    Pallas kernel sees a lane-dense (B, N) source and destination.
    """
    B, N, one = x.shape
    assert one == 1, "last dim must be 1 to squeeze"

    # Metadata-only reshape: lane-dense HBM operand for the kernel.
    x2d = jnp.reshape(x, (B, N))

    itemsize = jnp.dtype(x.dtype).itemsize
    return pl.pallas_call(
        squeeze_copy_kernel,
        out_shape=jax.ShapeDtypeStruct((B, N), x.dtype),
        grid=(),  # single VMEM tile; no pipeline
        in_specs=[pl.BlockSpec((B, N), lambda: (0, 0))],
        out_specs=pl.BlockSpec((B, N), lambda: (0, 0)),
        # Output reuses the input HBM buffer (same shape/dtype).
        input_output_aliases={0: 0},
        # Zero-flop hint: this call is pure (tiny) data movement.
        cost_estimate=pl.CostEstimate(
            flops=0,
            transcendentals=0,
            bytes_accessed=2 * B * N * itemsize,
        ),
    )(x2d)


if __name__ == "__main__":
    key = jax.random.PRNGKey(0)
    # Shape consistent with the module's example input: torch.Size([1, 384, 1])
    x535 = jax.random.normal(key, (1, 384, 1), dtype=jnp.float32)

    out = squeeze_last(x535)
    out = jax.block_until_ready(out)

    # Verify semantics against plain JAX squeeze
    ref = jnp.squeeze(x535, axis=-1)
    assert out.shape == (1, 384), out.shape
    assert out.dtype == x535.dtype
    assert jnp.array_equal(out, ref)

    print("KERNEL_OK")
</pallas_src>

<mosaic_0001>
module attributes {stable_mosaic.version = 11 : i64} {
  func.func @squeeze_copy_kernel(%arg0: memref<1x384xf32, #tpu.memory_space<vmem>>, %arg1: memref<1x384xf32, #tpu.memory_space<vmem>>) attributes {dimension_semantics = [], scalar_prefetch = 0 : i64, scratch_operands = 0 : i64, tpu.core_type = #tpu.core_type<tc>} {
    %c0 = arith.constant 0 : index
    %c0_0 = arith.constant 0 : index
    %0 = vector.load %arg0[%c0, %c0_0] : memref<1x384xf32, #tpu.memory_space<vmem>>, vector<1x384xf32>
    %c0_1 = arith.constant 0 : index
    %c0_2 = arith.constant 0 : index
    %1 = vector.load %arg1[%c0_1, %c0_2] : memref<1x384xf32, #tpu.memory_space<vmem>>, vector<1x384xf32>
    tpu.vector_store %arg1[%c0_1, %c0_2], %0 {strides = array<i32>} : memref<1x384xf32, #tpu.memory_space<vmem>>, vector<1x384xf32>,
    return
  }
}

</mosaic_0001>

<bundles_post_ra>
// kernel: tpu_custom_call.1
= control target key start
LH: loop header
LB: loop body
LE: loop exit
PB: predicated region body
PF: predicated region fallthrough
CT: control target
= control target key end

     0   :  { %6 = vsyncpa [#allocation3], 0  ;;  %s106_s0 = inlined_call_operand.hbm [shape: f32[1,384], index: 0, kind: input, shape index: {}, may-alias: {0,1}]   ;;  %s107_s1 = inlined_call_operand.hbm [shape: f32[1,384], index: 1, kind: output, shape index: {}, may-alias: {0,1}]  }
   0x1   :  { %7 = vsyncpa [#allocation4], 0  ;;  %s88_s6 = smov [#allocation2]  }
   0x2   :  { %s14_s7 = sshll.u32 %s88_s6, 4  ;;  %s15_s7 = int_to_ptr.vmem [resolvable:$true] %s14_s7 }
   0x3   :  { %s52_s8 = scalar_lea.vmem %s15_s7, 48  ;;  %s56_s9 = scalar_lea.vmem %s15_s7, 64 }
   0x4   :  { %p53_p0 = scmp.ne.s32.totalorder %s15_s7, %s52_s8  ;;  %p57_p1 = scmp.lt.s32.totalorder %s15_s7, %s15_s7 }
   0x5   :  { %p58_p2 = scmp.lt.s32.totalorder %s56_s9, %s52_s8 }
   0x7   :  { %p59_p3 = por %p58_p2, %p57_p1 }
   0x9   :  { %p60_p4 = pnand %p59_p3, %p53_p0 }
   0xb   :  { %63 = shalt.err (!%p60_p4)
}
   0xc   :  { %17 = dma.hbm_to_vmem [thread:$0]  %s106_s0, 48, %s15_s7, [#allocation3]  }
   0xd   :  { %84 = dma.done.wait [#allocation3], 48  }
   0xe   :  { %85 = vsyncadd [#allocation3], 4294967248  ;;  %v22_v0 = vlaneseq  ;;  %s89_s12 = smov [#allocation5]   ;;  %v21_v1 = vld [vmem:[#allocation2] sm:$0x7] }
   0xf   :  { %s33_s13 = sshll.u32 %s89_s12, 4  ;;  %s34_s13 = int_to_ptr.vmem [resolvable:$true] %s33_s13 }
  0x10   :  { %vm24_vm0 = vcmp.lt.s32.totalorder %v22_v0, 384  ;;  %s64_s14 = scalar_lea.vmem %s34_s13, 48  ;;  %s68_s15 = scalar_lea.vmem %s34_s13, 64 }
  0x11   :  { %26 = vst.msk [vmem:[#allocation5] sm:$0x7] %vm24_vm0, %v21_v1  ;;  %p65_p5 = scmp.ne.s32.totalorder %s34_s13, %s64_s14  ;;  %p69_p6 = scmp.lt.s32.totalorder %s34_s13, %s34_s13 }
  0x12   :  { %p70_p7 = scmp.lt.s32.totalorder %s68_s15, %s64_s14 }
  0x14   :  { %p71_p8 = por %p70_p7, %p69_p6 }
  0x16   :  { %p72_p9 = pnand %p71_p8, %p65_p5 }
  0x18   :  { %75 = shalt.err (!%p72_p9)
}
  0x19   :  { %36 = dma.vmem_to_hbm [thread:$0]  %s34_s13, 48, %s107_s1, [#allocation4]  }
  0x1a   :  { %86 = dma.done.wait [#allocation4], 48  }
  0x1b   :  { %87 = vsyncadd [#allocation4], 4294967248 }
  0x1c   :  { %40 = vsyncpa [#allocation3], 1 }
  0x1d   :  { %41 = vsyncpa [#allocation4], 1 }

</bundles_post_ra>
